<compile_context>
chip_gen: v6e
topology: v6e:2x2x1
jax: 0.10.0
libtpu: 0.0.40
codegen_flags: <defaults>
</compile_context>

<pallas_src>
import jax
import jax.numpy as jnp
from jax.experimental import pallas as pl
from jax.experimental.pallas import tpu as pltpu


def _exp_kernel_body(inv_ls_ref, x_ref, zt_ref, o_ref):
    """Compute one (bb, tT, tT2) covariance tile.

    inv_ls_ref: (bb, 1, D)    reciprocal lengthscales per flattened (k, n) row
    x_ref     : (bb, tT, D)
    zt_ref    : (bb, D, tT2)  Z pre-transposed so T2 is the lane (last) dim
    o_ref     : (bb, tT, tT2)
    """
    D = x_ref.shape[-1]
    r2 = jnp.zeros(o_ref.shape, jnp.float32)
    # Static unroll over the (small) feature dim: pure VPU work, no MXU, no transposes.
    for d in range(D):
        xd = x_ref[:, :, d:d + 1]              # (bb, tT, 1)   -> broadcast over lanes
        zd = zt_ref[:, d:d + 1, :]             # (bb, 1, tT2)  -> broadcast over sublanes
        inv_d = inv_ls_ref[:, :, d:d + 1]      # (bb, 1, 1)
        diff = (xd - zd) * inv_d               # (bb, tT, tT2)
        r2 = r2 + diff * diff
    r2 = jnp.maximum(r2, 0.0)                  # clamp(min=0) of the reference (no-op here)
    r = jnp.sqrt(r2 + 1e-12)                   # _torch_sqrt eps
    o_ref[...] = jnp.exp(-r).astype(o_ref.dtype)


def _largest_divisor(n, cap, align=1):
    """Largest divisor of n that is <= cap and a multiple of `align`; n itself if none."""
    if n <= cap:
        return n
    for d in range(min(n, cap), 0, -1):
        if n % d == 0 and d % align == 0:
            return d
    return n


def _pick_batch(b, t_tile, t2_tile, target_elems=128 * 1024):
    """Batch enough (K, N) pairs per grid step (~512 KiB f32 out tile) to amortize overhead."""
    cap = max(1, target_elems // max(1, t_tile * t2_tile))
    for d in range(min(b, cap), 0, -1):
        if b % d == 0:
            return d
    return 1


def exponential_forward(X, lengthscale_dn, Z=None, diag=False):
    """Exponential kernel forward.

    X:              (K, N, T, D) array
    lengthscale_dn: (D, N) positive lengthscales (the module's ctor arg; with f='exp'
                    the effective lengthscale equals this raw value)
    Z:              optional (K, N, T2, D); defaults to X
    diag:           if True, returns ones of shape (K, N, T) like the PyTorch module
    """
    K, N, T, D = X.shape
    if diag:
        # X.new_ones(K, n, T)
        return jnp.ones((K, N, T), dtype=X.dtype)
    if Z is None:
        Z = X
    T2 = Z.shape[2]
    B = K * N

    # Reciprocal lengthscales (tiny: B * D floats), broadcast over samples.
    inv_ls = (1.0 / lengthscale_dn.T).astype(X.dtype)                      # (N, D)
    inv_ls_b = jnp.broadcast_to(inv_ls[None], (K, N, D)).reshape(B, 1, D)  # (B, 1, D)

    Xb = X.reshape(B, T, D)                          # (B, T, D)   T in sublanes
    Ztb = jnp.swapaxes(Z.reshape(B, T2, D), 1, 2)    # (B, D, T2)  T2 lane-major

    # Tile sizes: modest output tiles (<= 256x512 f32 = 512 KiB) fit the default scoped
    # VMEM on every generation (incl. v7x's 64 MiB physical) yet approach the HBM roofline.
    tT = _largest_divisor(T, 256, align=8)       # sublane axis of the output tile
    tT2 = _largest_divisor(T2, 512, align=128)   # lane axis of the output tile
    bb = _pick_batch(B, tT, tT2)

    grid = (B // bb, T // tT, T2 // tT2)

    out = pl.pallas_call(
        _exp_kernel_body,
        out_shape=jax.ShapeDtypeStruct((B, T, T2), X.dtype),
        grid_spec=pltpu.PrefetchScalarGridSpec(
            num_scalar_prefetch=0,
            grid=grid,
            in_specs=[
                pl.BlockSpec((bb, 1, D), lambda b, i, j: (b, 0, 0)),
                pl.BlockSpec((bb, tT, D), lambda b, i, j: (b, i, 0)),
                pl.BlockSpec((bb, D, tT2), lambda b, i, j: (b, 0, j)),
            ],
            out_specs=pl.BlockSpec((bb, tT, tT2), lambda b, i, j: (b, i, j)),
        ),
        compiler_params=pltpu.CompilerParams(
            # No reduction axis: every output tile is written exactly once.
            dimension_semantics=("parallel", "parallel", "parallel"),
            # Working set here is only a few MiB; headroom for larger T/T2 tiles.
            vmem_limit_bytes=64 * 1024 * 1024,
        ),
    )(inv_ls_b, Xb, Ztb)

    return out.reshape(K, N, T, T2)


def _reference_forward(X, lengthscale_dn, Z=None):
    """Plain-JAX reference with the module's semantics: exp(-sqrt(||(x-z)/l||^2 + 1e-12)).

    Uses the well-conditioned direct distance form (mathematically identical to the
    PyTorch X2 - 2XZ + Z2 + clamp formulation, without its cancellation error).
    """
    if Z is None:
        Z = X
    l = lengthscale_dn.T[None, :, None, None, :]                 # (1, N, 1, 1, D)
    diff = (X[:, :, :, None, :] - Z[:, :, None, :, :]) / l       # (K, N, T, T2, D)
    r2 = jnp.maximum(jnp.sum(diff * diff, axis=-1), 0.0)         # clamp(min=0)
    return jnp.exp(-jnp.sqrt(r2 + 1e-12))


if __name__ == "__main__":
    K, N, T, D = 2, 4, 16, 4   # samples, neurons, timesteps, input_dims
    T2 = 8                     # second input's timesteps (cross-covariance case)

    key = jax.random.PRNGKey(0)
    kx, kl, kz = jax.random.split(key, 3)
    X = jax.random.normal(kx, (K, N, T, D), dtype=jnp.float32)
    Zc = jax.random.normal(kz, (K, N, T2, D), dtype=jnp.float32)
    # lengthscale parameter of shape (dims, neurons), positive (deterministic init)
    lengthscale = jax.random.uniform(kl, (D, N), dtype=jnp.float32, minval=0.5, maxval=2.0)

    # Self-covariance K(X, X)
    out = exponential_forward(X, lengthscale)
    out = jax.block_until_ready(out)
    assert out.shape == (K, N, T, T)
    ref = _reference_forward(X, lengthscale)
    assert jnp.allclose(out, ref, atol=1e-5, rtol=1e-5), float(jnp.max(jnp.abs(out - ref)))

    # Cross-covariance K(X, Z) with T2 != T
    out_xz = exponential_forward(X, lengthscale, Z=Zc)
    out_xz = jax.block_until_ready(out_xz)
    assert out_xz.shape == (K, N, T, T2)
    ref_xz = _reference_forward(X, lengthscale, Z=Zc)
    assert jnp.allclose(out_xz, ref_xz, atol=1e-5, rtol=1e-5), float(
        jnp.max(jnp.abs(out_xz - ref_xz)))

    # diag=True path (returns ones like the PyTorch module)
    diag_out = exponential_forward(X, lengthscale, diag=True)
    assert diag_out.shape == (K, N, T)
    assert bool(jnp.all(diag_out == 1.0))

    print("KERNEL_OK")
</pallas_src>

<mosaic_0001>
module attributes {stable_mosaic.version = 11 : i64} {
  func.func @_exp_kernel_body(%arg0: i32, %arg1: i32, %arg2: i32, %arg3: memref<8x1x4xf32, #tpu.memory_space<vmem>>, %arg4: memref<8x16x4xf32, #tpu.memory_space<vmem>>, %arg5: memref<8x4x16xf32, #tpu.memory_space<vmem>>, %arg6: memref<8x16x16xf32, #tpu.memory_space<vmem>>) attributes {dimension_semantics = [#tpu.dimension_semantics<parallel>, #tpu.dimension_semantics<parallel>, #tpu.dimension_semantics<parallel>], iteration_bounds = array<i64: 1, 1, 1>, scalar_prefetch = 0 : i64, scratch_operands = 0 : i64, tpu.core_type = #tpu.core_type<tc>, window_params = [{transform_indices = @transform_0, window_bounds = array<i64: 8, 1, 4>}, {transform_indices = @transform_1, window_bounds = array<i64: 8, 16, 4>}, {transform_indices = @transform_2, window_bounds = array<i64: 8, 4, 16>}, {transform_indices = @transform_3, window_bounds = array<i64: 8, 16, 16>}]} {
    %cst = arith.constant 0.000000e+00 : f32
    %0 = vector.broadcast %cst : f32 to vector<8x16x16xf32>
    %c0 = arith.constant 0 : index
    %c0_0 = arith.constant 0 : index
    %c0_1 = arith.constant 0 : index
    %1 = vector.load %arg4[%c0, %c0_0, %c0_1] : memref<8x16x4xf32, #tpu.memory_space<vmem>>, vector<8x16x1xf32>
    %c0_2 = arith.constant 0 : index
    %c0_3 = arith.constant 0 : index
    %c0_4 = arith.constant 0 : index
    %2 = vector.load %arg5[%c0_2, %c0_3, %c0_4] : memref<8x4x16xf32, #tpu.memory_space<vmem>>, vector<8x1x16xf32>
    %c0_5 = arith.constant 0 : index
    %c0_6 = arith.constant 0 : index
    %c0_7 = arith.constant 0 : index
    %3 = vector.load %arg3[%c0_5, %c0_6, %c0_7] : memref<8x1x4xf32, #tpu.memory_space<vmem>>, vector<8x1x1xf32>
    %4 = vector.broadcast %1 : vector<8x16x1xf32> to vector<8x16x16xf32>
    %5 = vector.broadcast %2 : vector<8x1x16xf32> to vector<8x16x16xf32>
    %6 = arith.subf %4, %5 : vector<8x16x16xf32>
    %7 = vector.broadcast %3 : vector<8x1x1xf32> to vector<8x16x16xf32>
    %8 = arith.mulf %6, %7 : vector<8x16x16xf32>
    %9 = arith.mulf %8, %8 : vector<8x16x16xf32>
    %10 = arith.addf %0, %9 : vector<8x16x16xf32>
    %c0_8 = arith.constant 0 : index
    %c0_9 = arith.constant 0 : index
    %c1 = arith.constant 1 : index
    %11 = vector.load %arg4[%c0_8, %c0_9, %c1] : memref<8x16x4xf32, #tpu.memory_space<vmem>>, vector<8x16x1xf32>
    %c0_10 = arith.constant 0 : index
    %c1_11 = arith.constant 1 : index
    %c0_12 = arith.constant 0 : index
    %12 = vector.load %arg5[%c0_10, %c1_11, %c0_12] : memref<8x4x16xf32, #tpu.memory_space<vmem>>, vector<8x1x16xf32>
    %c0_13 = arith.constant 0 : index
    %c0_14 = arith.constant 0 : index
    %c1_15 = arith.constant 1 : index
    %13 = vector.load %arg3[%c0_13, %c0_14, %c1_15] : memref<8x1x4xf32, #tpu.memory_space<vmem>>, vector<8x1x1xf32>
    %14 = vector.broadcast %11 : vector<8x16x1xf32> to vector<8x16x16xf32>
    %15 = vector.broadcast %12 : vector<8x1x16xf32> to vector<8x16x16xf32>
    %16 = arith.subf %14, %15 : vector<8x16x16xf32>
    %17 = vector.broadcast %13 : vector<8x1x1xf32> to vector<8x16x16xf32>
    %18 = arith.mulf %16, %17 : vector<8x16x16xf32>
    %19 = arith.mulf %18, %18 : vector<8x16x16xf32>
    %20 = arith.addf %10, %19 : vector<8x16x16xf32>
    %c0_16 = arith.constant 0 : index
    %c0_17 = arith.constant 0 : index
    %c2 = arith.constant 2 : index
    %21 = vector.load %arg4[%c0_16, %c0_17, %c2] : memref<8x16x4xf32, #tpu.memory_space<vmem>>, vector<8x16x1xf32>
    %c0_18 = arith.constant 0 : index
    %c2_19 = arith.constant 2 : index
    %c0_20 = arith.constant 0 : index
    %22 = vector.load %arg5[%c0_18, %c2_19, %c0_20] : memref<8x4x16xf32, #tpu.memory_space<vmem>>, vector<8x1x16xf32>
    %c0_21 = arith.constant 0 : index
    %c0_22 = arith.constant 0 : index
    %c2_23 = arith.constant 2 : index
    %23 = vector.load %arg3[%c0_21, %c0_22, %c2_23] : memref<8x1x4xf32, #tpu.memory_space<vmem>>, vector<8x1x1xf32>
    %24 = vector.broadcast %21 : vector<8x16x1xf32> to vector<8x16x16xf32>
    %25 = vector.broadcast %22 : vector<8x1x16xf32> to vector<8x16x16xf32>
    %26 = arith.subf %24, %25 : vector<8x16x16xf32>
    %27 = vector.broadcast %23 : vector<8x1x1xf32> to vector<8x16x16xf32>
    %28 = arith.mulf %26, %27 : vector<8x16x16xf32>
    %29 = arith.mulf %28, %28 : vector<8x16x16xf32>
    %30 = arith.addf %20, %29 : vector<8x16x16xf32>
    %c0_24 = arith.constant 0 : index
    %c0_25 = arith.constant 0 : index
    %c3 = arith.constant 3 : index
    %31 = vector.load %arg4[%c0_24, %c0_25, %c3] : memref<8x16x4xf32, #tpu.memory_space<vmem>>, vector<8x16x1xf32>
    %c0_26 = arith.constant 0 : index
    %c3_27 = arith.constant 3 : index
    %c0_28 = arith.constant 0 : index
    %32 = vector.load %arg5[%c0_26, %c3_27, %c0_28] : memref<8x4x16xf32, #tpu.memory_space<vmem>>, vector<8x1x16xf32>
    %c0_29 = arith.constant 0 : index
    %c0_30 = arith.constant 0 : index
    %c3_31 = arith.constant 3 : index
    %33 = vector.load %arg3[%c0_29, %c0_30, %c3_31] : memref<8x1x4xf32, #tpu.memory_space<vmem>>, vector<8x1x1xf32>
    %34 = vector.broadcast %31 : vector<8x16x1xf32> to vector<8x16x16xf32>
    %35 = vector.broadcast %32 : vector<8x1x16xf32> to vector<8x16x16xf32>
    %36 = arith.subf %34, %35 : vector<8x16x16xf32>
    %37 = vector.broadcast %33 : vector<8x1x1xf32> to vector<8x16x16xf32>
    %38 = arith.mulf %36, %37 : vector<8x16x16xf32>
    %39 = arith.mulf %38, %38 : vector<8x16x16xf32>
    %40 = arith.addf %30, %39 : vector<8x16x16xf32>
    %cst_32 = arith.constant 0.000000e+00 : f32
    %41 = vector.broadcast %cst_32 : f32 to vector<8x16x16xf32>
    %42 = arith.maximumf %40, %41 : vector<8x16x16xf32>
    %cst_33 = arith.constant 9.99999996E-13 : f32
    %43 = vector.broadcast %cst_33 : f32 to vector<8x16x16xf32>
    %44 = arith.addf %42, %43 : vector<8x16x16xf32>
    %45 = math.sqrt %44 : vector<8x16x16xf32>
    %cst_34 = arith.constant 0.000000e+00 : f32
    %46 = vector.broadcast %cst_34 : f32 to vector<8x16x16xf32>
    %47 = arith.subf %46, %45 : vector<8x16x16xf32>
    %48 = math.exp %47 : vector<8x16x16xf32>
    %c0_35 = arith.constant 0 : index
    %c0_36 = arith.constant 0 : index
    %c0_37 = arith.constant 0 : index
    %49 = vector.load %arg6[%c0_35, %c0_36, %c0_37] : memref<8x16x16xf32, #tpu.memory_space<vmem>>, vector<8x16x16xf32>
    tpu.vector_store %arg6[%c0_35, %c0_36, %c0_37], %48 {strides = array<i32>} : memref<8x16x16xf32, #tpu.memory_space<vmem>>, vector<8x16x16xf32>,
    return
  }
  func.func @transform_0(%arg0: i32, %arg1: i32, %arg2: i32) -> (i32, i32, i32) {
    %c0_i32 = arith.constant 0 : i32
    %c0_i32_0 = arith.constant 0 : i32
    %c0_i32_1 = arith.constant 0 : i32
    return %arg0, %c0_i32, %c0_i32_0 : i32, i32, i32
  }
  func.func @transform_1(%arg0: i32, %arg1: i32, %arg2: i32) -> (i32, i32, i32) {
    %c0_i32 = arith.constant 0 : i32
    %c0_i32_0 = arith.constant 0 : i32
    return %arg0, %arg1, %c0_i32 : i32, i32, i32
  }
  func.func @transform_2(%arg0: i32, %arg1: i32, %arg2: i32) -> (i32, i32, i32) {
    %c0_i32 = arith.constant 0 : i32
    %c0_i32_0 = arith.constant 0 : i32
    return %arg0, %c0_i32, %arg2 : i32, i32, i32
  }
  func.func @transform_3(%arg0: i32, %arg1: i32, %arg2: i32) -> (i32, i32, i32) {
    %c0_i32 = arith.constant 0 : i32
    return %arg0, %arg1, %arg2 : i32, i32, i32
  }
}

</mosaic_0001>

<bundles_post_ra>
// kernel: tpu_custom_call.1
= control target key start
LH: loop header
LB: loop body
LE: loop exit
PB: predicated region body
PF: predicated region fallthrough
CT: control target
= control target key end

     0   :  { %v1261_v2 = vmov 0   ;;  %s2022_s0 = inlined_call_operand.vmem [shape: f32[8,1,4], index: 0, kind: input, shape index: {}]   ;;  %s2023_s1 = inlined_call_operand.vmem [shape: f32[8,16,4], index: 1, kind: input, shape index: {}]   ;;  %s2024_s2 = inlined_call_operand.vmem [shape: f32[8,4,16], index: 2, kind: input, shape index: {}]   ;;  %s2025_s3 = inlined_call_operand.hbm [shape: f32[8,16,16], index: 3, kind: output, shape index: {}]  }
   0x1   :  { %v1291_v0 = vld [vmem:[%s2023_s1 + $0x10] sm:$0xff]  ;;  %v1296_v1 = vld [vmem:[%s2023_s1] sm:$0xff]  ;;  %1168 = vset.pattern.permute.xlu1 %v1261_v2  ;;  %1167 = vset.pattern.permute.xlu0 %v1261_v2  ;;  %v1303_v3 = vld [vmem:[%s2023_s1 + $0x18] sm:$0xff] }
   0x2   :  { %59 = vperm.xlu1 %1168, %v1291_v0   ;;  %49 = vperm.xlu0 %1167, %v1296_v1   ;;  %v1308_v4 = vld [vmem:[%s2023_s1 + $0x8] sm:$0xff]  ;;  %v1320_v6 = vld [vmem:[%s2023_s1 + $0x20] sm:$0xff] }
   0x3   :  { %v1315_v5 = vld [vmem:[%s2023_s1 + $0x28] sm:$0xff] }
   0x6   :  { %64 = vperm.xlu1 %1168, %v1303_v3   ;;  %54 = vperm.xlu0 %1167, %v1308_v4  }
   0x7   :  { %8 = vsyncpa [#allocation3], 0  ;;  %v1327_v7 = vld [vmem:[%s2023_s1 + $0x38] sm:$0xff]  ;;  %v1332_v8 = vld [vmem:[%s2023_s1 + $0x30] sm:$0xff]  ;;  %v1262_v25 = vmov 1   ;;  %v1263_v26 = vmov 2  }
   0x8   :  { %v1339_v9 = vld [vmem:[%s2023_s1 + $0x48] sm:$0xff]  ;;  %v1344_v10 = vld [vmem:[%s2023_s1 + $0x40] sm:$0xff]  ;;  %v1351_v11 = vld [vmem:[%s2023_s1 + $0x58] sm:$0xff]  ;;  %v1264_v37 = vmov 3  }
   0x9   :  { %v1356_v12 = vld [vmem:[%s2023_s1 + $0x50] sm:$0xff]  ;;  %v1363_v13 = vld [vmem:[%s2023_s1 + $0x68] sm:$0xff]  ;;  %v1368_v14 = vld [vmem:[%s2023_s1 + $0x60] sm:$0xff] }
   0xa   :  { %74 = vperm.xlu1 %1168, %v1315_v5   ;;  %69 = vperm.xlu0 %1167, %v1320_v6   ;;  %v1375_v15 = vld [vmem:[%s2023_s1 + $0x78] sm:$0xff]  ;;  %v1380_v16 = vld [vmem:[%s2023_s1 + $0x70] sm:$0xff]  ;;  %v1387_v17 = vld [vmem:[%s2022_s0 + $0x1] ss:$0 sm:$0xff] }
   0xb   :  { %v1392_v18 = vld [vmem:[%s2022_s0] ss:$0 sm:$0xff]  ;;  %v1399_v19 = vld [vmem:[%s2022_s0 + $0x3] ss:$0 sm:$0xff]  ;;  %v1404_v20 = vld [vmem:[%s2022_s0 + $0x2] ss:$0 sm:$0xff] }
   0xc   :  { %v1411_v21 = vld [vmem:[%s2022_s0 + $0x5] ss:$0 sm:$0xff]  ;;  %v1416_v22 = vld [vmem:[%s2022_s0 + $0x4] ss:$0 sm:$0xff]  ;;  %v1423_v23 = vld [vmem:[%s2022_s0 + $0x7] ss:$0 sm:$0xff] }
   0xd   :  { %v1428_v24 = vld [vmem:[%s2022_s0 + $0x6] ss:$0 sm:$0xff]  ;;  %v1121_v42 = vld [vmem:[%s2024_s2 + $0x4] ss:$0 sm:$0xff]  ;;  %v1120_v43 = vld [vmem:[%s2024_s2] ss:$0 sm:$0xff] }
   0xe   :  { %84 = vperm.xlu1 %1168, %v1327_v7   ;;  %79 = vperm.xlu0 %1167, %v1332_v8   ;;  %v1122_v50 = vld [vmem:[%s2024_s2 + $0x8] ss:$0 sm:$0xff]  ;;  %v1123_v51 = vld [vmem:[%s2024_s2 + $0xc] ss:$0 sm:$0xff]  ;;  %v1124_v62 = vld [vmem:[%s2024_s2 + $0x10] ss:$0 sm:$0xff] }
   0xf   :  { %v1125_v63 = vld [vmem:[%s2024_s2 + $0x14] ss:$0 sm:$0xff] }
  0x12   :  { %94 = vperm.xlu1 %1168, %v1339_v9   ;;  %89 = vperm.xlu0 %1167, %v1344_v10  }
  0x16   :  { %104 = vperm.xlu1 %1168, %v1351_v11   ;;  %99 = vperm.xlu0 %1167, %v1356_v12  }
  0x1a   :  { %114 = vperm.xlu1 %1168, %v1363_v13   ;;  %109 = vperm.xlu0 %1167, %v1368_v14  }
  0x1e   :  { %124 = vperm.xlu1 %1168, %v1375_v15   ;;  %119 = vperm.xlu0 %1167, %v1380_v16  }
  0x22   :  { %220 = vperm.xlu1 %1168, %v1387_v17   ;;  %216 = vperm.xlu0 %1167, %v1392_v18  }
  0x26   :  { %228 = vperm.xlu1 %1168, %v1399_v19   ;;  %224 = vperm.xlu0 %1167, %v1404_v20  }
  0x2a   :  { %236 = vperm.xlu1 %1168, %v1411_v21   ;;  %232 = vperm.xlu0 %1167, %v1416_v22  }
  0x2e   :  { %244 = vperm.xlu1 %1168, %v1423_v23   ;;  %240 = vperm.xlu0 %1167, %v1428_v24  }
  0x32   :  { %1170 = vset.pattern.permute.xlu1 %v1262_v25  ;;  %1169 = vset.pattern.permute.xlu0 %v1262_v25 }
  0x33   :  { %308 = vperm.xlu1 %1170, %v1308_v4   ;;  %304 = vperm.xlu0 %1169, %v1296_v1  }
  0x37   :  { %312 = vperm.xlu1 %1170, %v1291_v0   ;;  %316 = vperm.xlu0 %1169, %v1303_v3  }
  0x3b   :  { %320 = vperm.xlu1 %1170, %v1320_v6   ;;  %324 = vperm.xlu0 %1169, %v1315_v5  }
  0x3f   :  { %328 = vperm.xlu1 %1170, %v1332_v8   ;;  %332 = vperm.xlu0 %1169, %v1327_v7  }
  0x43   :  { %336 = vperm.xlu1 %1170, %v1344_v10   ;;  %340 = vperm.xlu0 %1169, %v1339_v9  }
  0x47   :  { %344 = vperm.xlu1 %1170, %v1356_v12   ;;  %348 = vperm.xlu0 %1169, %v1351_v11  }
  0x4b   :  { %352 = vperm.xlu1 %1170, %v1368_v14   ;;  %356 = vperm.xlu0 %1169, %v1363_v13  }
  0x4f   :  { %360 = vperm.xlu1 %1170, %v1380_v16   ;;  %364 = vperm.xlu0 %1169, %v1375_v15  }
  0x53   :  { %416 = vperm.xlu1 %1170, %v1392_v18   ;;  %420 = vperm.xlu0 %1169, %v1387_v17  }
  0x57   :  { %424 = vperm.xlu1 %1170, %v1404_v20   ;;  %428 = vperm.xlu0 %1169, %v1399_v19  }
  0x5b   :  { %432 = vperm.xlu1 %1170, %v1416_v22   ;;  %436 = vperm.xlu0 %1169, %v1411_v21  }
  0x5f   :  { %440 = vperm.xlu1 %1170, %v1428_v24   ;;  %444 = vperm.xlu0 %1169, %v1423_v23  }
  0x63   :  { %1171 = vset.pattern.permute.xlu1 %v1263_v26  ;;  %1172 = vset.pattern.permute.xlu0 %v1263_v26 }
  0x64   :  { %504 = vperm.xlu1 %1171, %v1296_v1   ;;  %508 = vperm.xlu0 %1172, %v1308_v4  }
  0x68   :  { %512 = vperm.xlu1 %1171, %v1291_v0   ;;  %520 = vperm.xlu0 %1172, %v1320_v6  }
  0x6c   :  { %516 = vperm.xlu1 %1171, %v1303_v3   ;;  %528 = vperm.xlu0 %1172, %v1332_v8  }
  0x70   :  { %524 = vperm.xlu1 %1171, %v1315_v5   ;;  %536 = vperm.xlu0 %1172, %v1344_v10  }
  0x74   :  { %532 = vperm.xlu1 %1171, %v1327_v7   ;;  %544 = vperm.xlu0 %1172, %v1356_v12  }
  0x78   :  { %540 = vperm.xlu1 %1171, %v1339_v9   ;;  %552 = vperm.xlu0 %1172, %v1368_v14  }
  0x7c   :  { %548 = vperm.xlu1 %1171, %v1351_v11   ;;  %560 = vperm.xlu0 %1172, %v1380_v16  }
  0x7d   :  { %v60_v27 = vpop.permute.xlu1 %59  ;;  %v50_v28 = vpop.permute.xlu0 %49 }
  0x7e   :  { %v161_v46 = vsub.f32 %v60_v27, %v1121_v42  ;;  %v159_v47 = vsub.f32 %v50_v28, %v1120_v43  ;;  %v1126_v28 = vld [vmem:[%s2024_s2 + $0x18] ss:$0 sm:$0xff] }
  0x80   :  { %556 = vperm.xlu1 %1171, %v1363_v13   ;;  %616 = vperm.xlu0 %1172, %v1392_v18  }
  0x81   :  { %v65_v29 = vpop.permute.xlu1 %64  ;;  %v55_v30 = vpop.permute.xlu0 %54 }
  0x82   :  { %v162_v48 = vsub.f32 %v65_v29, %v1121_v42  ;;  %v160_v49 = vsub.f32 %v55_v30, %v1120_v43 }
  0x84   :  { %564 = vperm.xlu1 %1171, %v1375_v15   ;;  %624 = vperm.xlu0 %1172, %v1404_v20  }
  0x85   :  { %v75_v31 = vpop.permute.xlu1 %74  ;;  %v70_v32 = vpop.permute.xlu0 %69 }
  0x86   :  { %v164_v58 = vsub.f32 %v75_v31, %v1122_v50  ;;  %v163_v59 = vsub.f32 %v70_v32, %v1122_v50 }
  0x88   :  { %620 = vperm.xlu1 %1171, %v1387_v17   ;;  %632 = vperm.xlu0 %1172, %v1416_v22  }
  0x89   :  { %v85_v33 = vpop.permute.xlu1 %84  ;;  %v80_v34 = vpop.permute.xlu0 %79 }
  0x8a   :  { %v166_v60 = vsub.f32 %v85_v33, %v1123_v51  ;;  %v165_v61 = vsub.f32 %v80_v34, %v1123_v51 }
  0x8c   :  { %628 = vperm.xlu1 %1171, %v1399_v19   ;;  %640 = vperm.xlu0 %1172, %v1428_v24  }
  0x8d   :  { %v95_v35 = vpop.permute.xlu1 %94  ;;  %v90_v36 = vpop.permute.xlu0 %89 }
  0x8e   :  { %v167_v25 = vsub.f32 %v90_v36, %v1124_v62 }
  0x90   :  { %636 = vperm.xlu1 %1171, %v1411_v21   ;;  %1173 = vset.pattern.permute.xlu0 %v1264_v37 }
  0x91   :  { %v105_v38 = vpop.permute.xlu1 %104  ;;  %704 = vperm.xlu0 %1173, %v1296_v1   ;;  %v100_v39 = vpop.permute.xlu0 %99 }
  0x92   :  { %v170_v26 = vsub.f32 %v105_v38, %v1125_v63  ;;  %v169_v27 = vsub.f32 %v100_v39, %v1125_v63 }
  0x94   :  { %644 = vperm.xlu1 %1171, %v1423_v23  }
  0x95   :  { %v1481_v40 = vpop.permute.xlu1 %114  ;;  %716 = vperm.xlu0 %1173, %v1303_v3   ;;  %v110_v41 = vpop.permute.xlu0 %109 }
  0x96   :  { %v172_v34 = vsub.f32 %v1481_v40, %v1126_v28 }
  0x98   :  { %1174 = vset.pattern.permute.xlu1 %v1264_v37 }
  0x99   :  { %v125_v44 = vpop.permute.xlu1 %124  ;;  %708 = vperm.xlu1 %1174, %v1308_v4   ;;  %724 = vperm.xlu0 %1173, %v1315_v5   ;;  %v120_v45 = vpop.permute.xlu0 %119 }
  0x9d   :  { %v221_v52 = vpop.permute.xlu1 %220  ;;  %712 = vperm.xlu1 %1174, %v1291_v0   ;;  %732 = vperm.xlu0 %1173, %v1327_v7   ;;  %v217_v53 = vpop.permute.xlu0 %216  ;;  %v168_v7 = vsub.f32 %v95_v35, %v1124_v62  ;;  %v171_v35 = vsub.f32 %v110_v41, %v1126_v28 }
  0x9e   :  { %v1500_v54 = vmul.f32 %v221_v52, %v161_v46  ;;  %v1502_v55 = vmul.f32 %v221_v52, %v162_v48  ;;  %v1504_v56 = vmul.f32 %v217_v53, %v159_v47  ;;  %v1506_v57 = vmul.f32 %v217_v53, %v160_v49 }
  0xa0   :  { %v265_v47 = vmul.f32 %v1500_v54, %v1500_v54  ;;  %v263_v48 = vmul.f32 %v1504_v56, %v1504_v56  ;;  %v264_v49 = vmul.f32 %v1506_v57, %v1506_v57  ;;  %v1138_v57 = vld [vmem:[%s2024_s2 + $0x9] ss:$0 sm:$0xff] }
  0xa1   :  { %v229_v0 = vpop.permute.xlu1 %228  ;;  %720 = vperm.xlu1 %1174, %v1320_v6   ;;  %740 = vperm.xlu0 %1173, %v1339_v9   ;;  %v225_v1 = vpop.permute.xlu0 %224  ;;  %v1127_v6 = vld [vmem:[%s2024_s2 + $0x1c] ss:$0 sm:$0xff] }
  0xa2   :  { %v1516_v2 = vmul.f32 %v229_v0, %v165_v61  ;;  %v1518_v3 = vmul.f32 %v229_v0, %v166_v60  ;;  %v1520_v4 = vmul.f32 %v225_v1, %v163_v59  ;;  %v1522_v5 = vmul.f32 %v225_v1, %v164_v58  ;;  %v1139_v61 = vld [vmem:[%s2024_s2 + $0xd] ss:$0 sm:$0xff] }
  0xa3   :  { %v174_v36 = vsub.f32 %v125_v44, %v1127_v6  ;;  %v173_v37 = vsub.f32 %v120_v45, %v1127_v6 }
  0xa4   :  { %v269_v58 = vmul.f32 %v1516_v2, %v1516_v2  ;;  %v270_v59 = vmul.f32 %v1518_v3, %v1518_v3  ;;  %v267_v54 = vmul.f32 %v1520_v4, %v1520_v4 }
  0xa5   :  { %v237_v9 = vpop.permute.xlu1 %236  ;;  %728 = vperm.xlu1 %1174, %v1332_v8   ;;  %748 = vperm.xlu0 %1173, %v1351_v11   ;;  %v233_v29 = vpop.permute.xlu0 %232 }
  0xa6   :  { %v1532_v30 = vmul.f32 %v237_v9, %v169_v27  ;;  %v1534_v31 = vmul.f32 %v237_v9, %v170_v26  ;;  %v1536_v32 = vmul.f32 %v233_v29, %v167_v25  ;;  %v1538_v33 = vmul.f32 %v233_v29, %v168_v7 }
  0xa8   :  { %v273_v2 = vmul.f32 %v1532_v30, %v1532_v30  ;;  %v274_v3 = vmul.f32 %v1534_v31, %v1534_v31  ;;  %v271_v4 = vmul.f32 %v1536_v32, %v1536_v32  ;;  %v1140_v30 = vld [vmem:[%s2024_s2 + $0x11] ss:$0 sm:$0xff]  ;;  %v1141_v31 = vld [vmem:[%s2024_s2 + $0x15] ss:$0 sm:$0xff] }
  0xa9   :  { %v245_v38 = vpop.permute.xlu1 %244  ;;  %736 = vperm.xlu1 %1174, %v1344_v10   ;;  %756 = vperm.xlu0 %1173, %v1363_v13   ;;  %v241_v8 = vpop.permute.xlu0 %240 }
  0xaa   :  { %v1543_v11 = vmul.f32 %v245_v38, %v173_v37  ;;  %v1545_v39 = vmul.f32 %v245_v38, %v174_v36  ;;  %v1547_v42 = vmul.f32 %v241_v8, %v171_v35  ;;  %v1549_v43 = vmul.f32 %v241_v8, %v172_v34 }
  0xad   :  { %744 = vperm.xlu1 %1174, %v1356_v12   ;;  %764 = vperm.xlu0 %1173, %v1375_v15  }
  0xae   :  { %v309_v40 = vpop.permute.xlu1 %308  ;;  %v305_v41 = vpop.permute.xlu0 %304 }
  0xb1   :  { %752 = vperm.xlu1 %1174, %v1368_v14   ;;  %820 = vperm.xlu0 %1173, %v1387_v17  }
  0xb2   :  { %v313_v10 = vpop.permute.xlu1 %312  ;;  %v317_v13 = vpop.permute.xlu0 %316 }
  0xb5   :  { %760 = vperm.xlu1 %1174, %v1380_v16   ;;  %828 = vperm.xlu0 %1173, %v1399_v19  }
  0xb6   :  { %v321_v44 = vpop.permute.xlu1 %320  ;;  %v325_v45 = vpop.permute.xlu0 %324 }
  0xb7   :  { %v403_v28 = vsub.f32 %v321_v44, %v1138_v57  ;;  %v404_v6 = vsub.f32 %v325_v45, %v1138_v57 }
  0xb9   :  { %816 = vperm.xlu1 %1174, %v1392_v18   ;;  %836 = vperm.xlu0 %1173, %v1411_v21  }
  0xba   :  { %v329_v12 = vpop.permute.xlu1 %328  ;;  %v333_v15 = vpop.permute.xlu0 %332 }
  0xbb   :  { %v405_v9 = vsub.f32 %v329_v12, %v1139_v61  ;;  %v406_v29 = vsub.f32 %v333_v15, %v1139_v61 }
  0xbd   :  { %824 = vperm.xlu1 %1174, %v1404_v20   ;;  %844 = vperm.xlu0 %1173, %v1423_v23   ;;  %v1136_v20 = vld [vmem:[%s2024_s2 + $0x1] ss:$0 sm:$0xff]  ;;  %v1137_v23 = vld [vmem:[%s2024_s2 + $0x5] ss:$0 sm:$0xff] }
  0xbe   :  { %v1561_v14 = vpop.permute.xlu1 %336  ;;  %v1563_v17 = vpop.permute.xlu0 %340  ;;  %v400_v50 = vsub.f32 %v309_v40, %v1136_v20  ;;  %v399_v51 = vsub.f32 %v305_v41, %v1136_v20  ;;  %v401_v52 = vsub.f32 %v313_v10, %v1137_v23  ;;  %v402_v53 = vsub.f32 %v317_v13, %v1137_v23 }
  0xbf   :  { %v407_v10 = vsub.f32 %v1561_v14, %v1140_v30  ;;  %v408_v13 = vsub.f32 %v1563_v17, %v1140_v30  ;;  %v1143_v14 = vld [vmem:[%s2024_s2 + $0x1d] ss:$0 sm:$0xff] }
  0xc1   :  { %832 = vperm.xlu1 %1174, %v1416_v22  }
  0xc2   :  { %v1566_v16 = vpop.permute.xlu1 %344  ;;  %v1568_v19 = vpop.permute.xlu0 %348 }
  0xc3   :  { %v409_v44 = vsub.f32 %v1566_v16, %v1141_v31  ;;  %v410_v45 = vsub.f32 %v1568_v19, %v1141_v31 }
  0xc5   :  { %840 = vperm.xlu1 %1174, %v1428_v24   ;;  %v266_v24 = vmul.f32 %v1502_v55, %v1502_v55  ;;  %v268_v55 = vmul.f32 %v1522_v5, %v1522_v5  ;;  %v272_v5 = vmul.f32 %v1538_v33, %v1538_v33 }
  0xc6   :  { %v1571_v18 = vpop.permute.xlu1 %352  ;;  %v1573_v21 = vpop.permute.xlu0 %356 }
  0xca   :  { %v1581_v46 = vpop.permute.xlu1 %360  ;;  %v1583_v22 = vpop.permute.xlu0 %364 }
  0xce   :  { %v417_v56 = vpop.permute.xlu1 %416  ;;  %v421_v60 = vpop.permute.xlu0 %420 }
  0xcf   :  { %v447_v62 = vmul.f32 %v417_v56, %v399_v51  ;;  %v448_v63 = vmul.f32 %v417_v56, %v400_v50  ;;  %v449_v0 = vmul.f32 %v421_v60, %v401_v52  ;;  %v450_v1 = vmul.f32 %v421_v60, %v402_v53 }
  0xd1   :  { %v463_v7 = vmul.f32 %v447_v62, %v447_v62  ;;  %v464_v25 = vmul.f32 %v448_v63, %v448_v63  ;;  %v465_v26 = vmul.f32 %v449_v0, %v449_v0  ;;  %v466_v27 = vmul.f32 %v450_v1, %v450_v1 }
  0xd2   :  { %v425_v32 = vpop.permute.xlu1 %424  ;;  %v429_v34 = vpop.permute.xlu0 %428  ;;  %v413_v0 = vsub.f32 %v1581_v46, %v1143_v14  ;;  %v414_v1 = vsub.f32 %v1583_v22, %v1143_v14  ;;  %v278_v46 = vmul.f32 %v1545_v39, %v1545_v39  ;;  %v275_v22 = vmul.f32 %v1547_v42, %v1547_v42 }
  0xd3   :  { %v1621_v35 = vadd.f32 %v463_v7, %v263_v48  ;;  %v1623_v33 = vadd.f32 %v464_v25, %v264_v49  ;;  %v1625_v36 = vadd.f32 %v465_v26, %v265_v47  ;;  %v1627_v37 = vadd.f32 %v466_v27, %v266_v24  ;;  %v1142_v24 = vld [vmem:[%s2024_s2 + $0x19] ss:$0 sm:$0xff] }
  0xd4   :  { %v451_v38 = vmul.f32 %v425_v32, %v403_v28  ;;  %v452_v8 = vmul.f32 %v425_v32, %v404_v6  ;;  %v453_v40 = vmul.f32 %v429_v34, %v405_v9  ;;  %v454_v41 = vmul.f32 %v429_v34, %v406_v29 }
  0xd5   :  { %v411_v62 = vsub.f32 %v1571_v18, %v1142_v24  ;;  %v412_v63 = vsub.f32 %v1573_v21, %v1142_v24  ;;  %v277_v21 = vmul.f32 %v1543_v11, %v1543_v11 }
  0xd6   :  { %v467_v12 = vmul.f32 %v451_v38, %v451_v38  ;;  %v468_v15 = vmul.f32 %v452_v8, %v452_v8  ;;  %v469_v20 = vmul.f32 %v453_v40, %v453_v40  ;;  %v470_v23 = vmul.f32 %v454_v41, %v454_v41  ;;  %v433_v47 = vpop.permute.xlu1 %432  ;;  %v437_v48 = vpop.permute.xlu0 %436 }
  0xd7   :  { %v455_v49 = vmul.f32 %v433_v47, %v407_v10  ;;  %v456_v17 = vmul.f32 %v433_v47, %v408_v13  ;;  %v457_v50 = vmul.f32 %v437_v48, %v409_v44  ;;  %v458_v16 = vmul.f32 %v437_v48, %v410_v45  ;;  %v1144_v44 = vld [vmem:[%s2024_s2 + $0x2] ss:$0 sm:$0xff] }
  0xd8   :  { %v1639_v51 = vadd.f32 %v467_v12, %v267_v54  ;;  %v1641_v19 = vadd.f32 %v468_v15, %v268_v55  ;;  %v1643_v52 = vadd.f32 %v469_v20, %v269_v58  ;;  %v1645_v53 = vadd.f32 %v470_v23, %v270_v59  ;;  %v1146_v23 = vld [vmem:[%s2024_s2 + $0xa] ss:$0 sm:$0xff] }
  0xd9   :  { %v471_v56 = vmul.f32 %v455_v49, %v455_v49  ;;  %v472_v60 = vmul.f32 %v456_v17, %v456_v17  ;;  %v473_v57 = vmul.f32 %v457_v50, %v457_v50  ;;  %v474_v61 = vmul.f32 %v458_v16, %v458_v16  ;;  %v1692_v16 = vld [vmem:[%s2024_s2 + $0x6] ss:$0 sm:$0xff] }
  0xda   :  { %v441_v54 = vpop.permute.xlu1 %440  ;;  %v445_v7 = vpop.permute.xlu0 %444 }
  0xdb   :  { %v1651_v55 = vadd.f32 %v471_v56, %v271_v4  ;;  %v1653_v58 = vadd.f32 %v472_v60, %v272_v5  ;;  %v1655_v59 = vadd.f32 %v473_v57, %v273_v2  ;;  %v1657_v25 = vadd.f32 %v474_v61, %v274_v3  ;;  %v1148_v60 = vld [vmem:[%s2024_s2 + $0x12] ss:$0 sm:$0xff] }
  0xdc   :  { %v459_v26 = vmul.f32 %v441_v54, %v411_v62  ;;  %v460_v27 = vmul.f32 %v441_v54, %v412_v63  ;;  %v461_v28 = vmul.f32 %v445_v7, %v413_v0  ;;  %v462_v18 = vmul.f32 %v445_v7, %v414_v1 }
  0xdd   :  { %v276_v4 = vmul.f32 %v1549_v43, %v1549_v43 }
  0xde   :  { %v475_v2 = vmul.f32 %v459_v26, %v459_v26  ;;  %v476_v5 = vmul.f32 %v460_v27, %v460_v27  ;;  %v477_v3 = vmul.f32 %v461_v28, %v461_v28  ;;  %v478_v6 = vmul.f32 %v462_v18, %v462_v18  ;;  %v1707_v27 = vld [vmem:[%s2024_s2 + $0xe] ss:$0 sm:$0xff] }
  0xdf   :  { %v505_v9 = vpop.permute.xlu1 %504  ;;  %v509_v29 = vpop.permute.xlu0 %508 }
  0xe0   :  { %v1667_v30 = vadd.f32 %v475_v2, %v275_v22  ;;  %v1669_v31 = vadd.f32 %v476_v5, %v276_v4  ;;  %v1671_v11 = vadd.f32 %v477_v3, %v277_v21  ;;  %v1673_v32 = vadd.f32 %v478_v6, %v278_v46 }
  0xe1   :  { %v599_v15 = vsub.f32 %v505_v9, %v1144_v44  ;;  %v600_v20 = vsub.f32 %v509_v29, %v1144_v44  ;;  %v1722_v29 = vld [vmem:[%s2024_s2 + $0x16] ss:$0 sm:$0xff] }
  0xe3   :  { %v513_v39 = vpop.permute.xlu1 %512  ;;  %v521_v34 = vpop.permute.xlu0 %520 }
  0xe4   :  { %v603_v49 = vsub.f32 %v521_v34, %v1146_v23  ;;  %v601_v54 = vsub.f32 %v513_v39, %v1692_v16 }
  0xe7   :  { %v1675_v42 = vpop.permute.xlu1 %516  ;;  %v529_v38 = vpop.permute.xlu0 %528 }
  0xe8   :  { %v605_v3 = vsub.f32 %v529_v38, %v1707_v27 }
  0xeb   :  { %v525_v43 = vpop.permute.xlu1 %524  ;;  %v537_v8 = vpop.permute.xlu0 %536 }
  0xec   :  { %v604_v56 = vsub.f32 %v525_v43, %v1146_v23  ;;  %v607_v7 = vsub.f32 %v537_v8, %v1148_v60 }
  0xef   :  { %v1677_v40 = vpop.permute.xlu1 %532  ;;  %v545_v41 = vpop.permute.xlu0 %544 }
  0xf0   :  { %v609_v23 = vsub.f32 %v545_v41, %v1722_v29 }
  0xf3   :  { %v541_v10 = vpop.permute.xlu1 %540  ;;  %v553_v13 = vpop.permute.xlu0 %552 }
  0xf4   :  { %v608_v28 = vsub.f32 %v541_v10, %v1148_v60 }
  0xf7   :  { %v1682_v45 = vpop.permute.xlu1 %548  ;;  %v1684_v12 = vpop.permute.xlu0 %560 }
  0xfb   :  { %v557_v47 = vpop.permute.xlu1 %556  ;;  %v617_v48 = vpop.permute.xlu0 %616 }
  0xfc   :  { %v647_v24 = vmul.f32 %v617_v48, %v599_v15  ;;  %v648_v14 = vmul.f32 %v617_v48, %v600_v20 }
  0xfe   :  { %v663_v17 = vmul.f32 %v647_v24, %v647_v24  ;;  %v664_v50 = vmul.f32 %v648_v14, %v648_v14 }
  0xff   :  { %v565_v57 = vpop.permute.xlu1 %564  ;;  %v625_v61 = vpop.permute.xlu0 %624 }
 0x100   :  { %v1698_v62 = vadd.f32 %v663_v17, %v1621_v35  ;;  %v1701_v63 = vadd.f32 %v664_v50, %v1623_v33  ;;  %v651_v0 = vmul.f32 %v625_v61, %v603_v49  ;;  %v652_v1 = vmul.f32 %v625_v61, %v604_v56  ;;  %v1150_v35 = vld [vmem:[%s2024_s2 + $0x1a] ss:$0 sm:$0xff] }
 0x101   :  { %v611_v39 = vsub.f32 %v553_v13, %v1150_v35  ;;  %v612_v34 = vsub.f32 %v557_v47, %v1150_v35  ;;  %v1151_v13 = vld [vmem:[%s2024_s2 + $0x1e] ss:$0 sm:$0xff] }
 0x102   :  { %v667_v26 = vmul.f32 %v651_v0, %v651_v0  ;;  %v668_v18 = vmul.f32 %v652_v1, %v652_v1  ;;  %v613_v41 = vsub.f32 %v1684_v12, %v1151_v13  ;;  %v614_v50 = vsub.f32 %v565_v57, %v1151_v13 }
 0x103   :  { %v621_v21 = vpop.permute.xlu1 %620  ;;  %v633_v46 = vpop.permute.xlu0 %632 }
 0x104   :  { %v1713_v33 = vadd.f32 %v667_v26, %v1639_v51  ;;  %v649_v22 = vmul.f32 %v621_v21, %v601_v54  ;;  %v655_v4 = vmul.f32 %v633_v46, %v607_v7  ;;  %v1716_v2 = vadd.f32 %v668_v18, %v1641_v19 }
 0x105   :  { %v656_v5 = vmul.f32 %v633_v46, %v608_v28 }
 0x106   :  { %v665_v6 = vmul.f32 %v649_v22, %v649_v22  ;;  %v671_v9 = vmul.f32 %v655_v4, %v655_v4  ;;  %v602_v22 = vsub.f32 %v1675_v42, %v1692_v16 }
 0x107   :  { %v672_v43 = vmul.f32 %v656_v5, %v656_v5  ;;  %v629_v51 = vpop.permute.xlu1 %628  ;;  %v641_v8 = vpop.permute.xlu0 %640  ;;  %v606_v5 = vsub.f32 %v1677_v40, %v1707_v27  ;;  %v1155_v40 = vld [vmem:[%s2024_s2 + $0xf] ss:$0 sm:$0xff] }
 0x108   :  { %v1725_v10 = vadd.f32 %v665_v6, %v1625_v36  ;;  %v1728_v19 = vadd.f32 %v671_v9, %v1651_v55  ;;  %v653_v44 = vmul.f32 %v629_v51, %v605_v3  ;;  %v659_v15 = vmul.f32 %v641_v8, %v611_v39  ;;  %v1153_v3 = vld [vmem:[%s2024_s2 + $0x7] ss:$0 sm:$0xff] }
 0x109   :  { %v1731_v38 = vadd.f32 %v672_v43, %v1653_v58  ;;  %v660_v20 = vmul.f32 %v641_v8, %v612_v34  ;;  %v654_v34 = vmul.f32 %v629_v51, %v606_v5  ;;  %v1152_v51 = vld [vmem:[%s2024_s2 + $0x3] ss:$0 sm:$0xff] }
 0x10a   :  { %v669_v48 = vmul.f32 %v653_v44, %v653_v44  ;;  %v675_v47 = vmul.f32 %v659_v15, %v659_v15 }
 0x10b   :  { %v676_v24 = vmul.f32 %v660_v20, %v660_v20  ;;  %v637_v36 = vpop.permute.xlu1 %636  ;;  %v670_v20 = vmul.f32 %v654_v34, %v654_v34 }
 0x10c   :  { %v1738_v14 = vadd.f32 %v669_v48, %v1643_v52  ;;  %v657_v55 = vmul.f32 %v637_v36, %v609_v23  ;;  %v1740_v49 = vpop.permute.xlu0 %704  ;;  %v1743_v58 = vadd.f32 %v675_v47, %v1667_v30 }
 0x10d   :  { %v1746_v17 = vadd.f32 %v676_v24, %v1669_v31 }
 0x10e   :  { %v673_v56 = vmul.f32 %v657_v55, %v657_v55 }
 0x10f   :  { %v645_v60 = vpop.permute.xlu1 %644 }
 0x110   :  { %v1750_v61 = vadd.f32 %v673_v56, %v1655_v59  ;;  %v661_v0 = vmul.f32 %v645_v60, %v613_v41  ;;  %v662_v52 = vmul.f32 %v645_v60, %v614_v50  ;;  %v717_v1 = vpop.permute.xlu0 %716  ;;  %v799_v56 = vsub.f32 %v1740_v49, %v1152_v51 }
 0x111   :  { %v802_v43 = vsub.f32 %v717_v1, %v1153_v3 }
 0x112   :  { %v677_v54 = vmul.f32 %v661_v0, %v661_v0  ;;  %v678_v7 = vmul.f32 %v662_v52, %v662_v52 }
 0x114   :  { %v1753_v26 = vadd.f32 %v677_v54, %v1671_v11  ;;  %v1756_v30 = vadd.f32 %v678_v7, %v1673_v32  ;;  %v709_v31 = vpop.permute.xlu1 %708  ;;  %v1758_v28 = vpop.permute.xlu0 %724  ;;  %v650_v32 = vmul.f32 %v621_v21, %v602_v22  ;;  %v610_v21 = vsub.f32 %v1682_v45, %v1722_v29  ;;  %v1157_v29 = vld [vmem:[%s2024_s2 + $0x17] ss:$0 sm:$0xff] }
 0x115   :  { %v800_v7 = vsub.f32 %v709_v31, %v1152_v51 }
 0x116   :  { %v666_v39 = vmul.f32 %v650_v32, %v650_v32  ;;  %v658_v23 = vmul.f32 %v637_v36, %v610_v21  ;;  %v686_v36 = vadd.f32 %v670_v20, %v1645_v53 }
 0x118   :  { %v713_v12 = vpop.permute.xlu1 %712  ;;  %v733_v57 = vpop.permute.xlu0 %732  ;;  %v682_v15 = vadd.f32 %v666_v39, %v1627_v37  ;;  %v674_v0 = vmul.f32 %v658_v23, %v658_v23 }
 0x119   :  { %v801_v8 = vsub.f32 %v713_v12, %v1153_v3  ;;  %v806_v24 = vsub.f32 %v733_v57, %v1155_v40 }
 0x11c   :  { %v1760_v18 = vpop.permute.xlu1 %720  ;;  %v1762_v59 = vpop.permute.xlu0 %740 }
 0x120   :  { %v729_v46 = vpop.permute.xlu1 %728  ;;  %v749_v35 = vpop.permute.xlu0 %748 }
 0x121   :  { %v805_v48 = vsub.f32 %v729_v46, %v1155_v40  ;;  %v810_v12 = vsub.f32 %v749_v35, %v1157_v29  ;;  %v690_v35 = vadd.f32 %v674_v0, %v1657_v25 }
 0x124   :  { %v1766_v4 = vpop.permute.xlu1 %736  ;;  %v1768_v11 = vpop.permute.xlu0 %756 }
 0x128   :  { %v745_v6 = vpop.permute.xlu1 %744  ;;  %v1775_v9 = vpop.permute.xlu0 %764 }
 0x129   :  { %v809_v57 = vsub.f32 %v745_v6, %v1157_v29 }
 0x12c   :  { %v1777_v42 = vpop.permute.xlu1 %752  ;;  %v821_v16 = vpop.permute.xlu0 %820 }
 0x12d   :  { %v849_v27 = vmul.f32 %v821_v16, %v801_v8  ;;  %v850_v44 = vmul.f32 %v821_v16, %v802_v43 }
 0x12f   :  { %v865_v13 = vmul.f32 %v849_v27, %v849_v27  ;;  %v866_v47 = vmul.f32 %v850_v44, %v850_v44  ;;  %v1812_v44 = vld [vmem:[%s2024_s2 + $0x13] ss:$0 sm:$0xff] }
 0x130   :  { %v1788_v55 = vpop.permute.xlu1 %760  ;;  %v829_v45 = vpop.permute.xlu0 %828 }
 0x131   :  { %v881_v41 = vadd.f32 %v865_v13, %v1725_v10  ;;  %v882_v37 = vadd.f32 %v866_v47, %v682_v15  ;;  %v853_v50 = vmul.f32 %v829_v45, %v805_v48  ;;  %v854_v60 = vmul.f32 %v829_v45, %v806_v24  ;;  %v1154_v10 = vld [vmem:[%s2024_s2 + $0xb] ss:$0 sm:$0xff] }
 0x132   :  { %v804_v6 = vsub.f32 %v1758_v28, %v1154_v10  ;;  %v803_v8 = vsub.f32 %v1760_v18, %v1154_v10  ;;  %v1159_v28 = vld [vmem:[%s2024_s2 + $0x1f] ss:$0 sm:$0xff] }
 0x133   :  { %v897_v52 = vmax.f32 %v881_v41, 0.0  ;;  %v898_v1 = vmax.f32 %v882_v37, 0.0  ;;  %v869_v54 = vmul.f32 %v853_v50, %v853_v50  ;;  %v870_v46 = vmul.f32 %v854_v60, %v854_v60 }
 0x134   :  { %v817_v22 = vpop.permute.xlu1 %816  ;;  %v837_v32 = vpop.permute.xlu0 %836  ;;  %v808_v41 = vsub.f32 %v1762_v59, %v1812_v44  ;;  %v807_v37 = vsub.f32 %v1766_v4, %v1812_v44  ;;  %v814_v50 = vsub.f32 %v1775_v9, %v1159_v28  ;;  %v813_v0 = vsub.f32 %v1788_v55, %v1159_v28 }
 0x135   :  { %v1799_v5 = vadd.f32 1e-12, %v897_v52  ;;  %v1801_v53 = vadd.f32 1e-12, %v898_v1  ;;  %v885_v49 = vadd.f32 %v869_v54, %v1738_v14  ;;  %v847_v3 = vmul.f32 %v817_v22, %v799_v56 }
 0x136   :  { %v886_v39 = vadd.f32 %v870_v46, %v686_v36  ;;  %v848_v34 = vmul.f32 %v817_v22, %v800_v7  ;;  %v857_v43 = vmul.f32 %v837_v32, %v809_v57  ;;  %v858_v31 = vmul.f32 %v837_v32, %v810_v12 }
 0x137   :  { %1175 = vrsqrt.f32 %v1799_v5  ;;  %v901_v21 = vmax.f32 %v885_v49, 0.0  ;;  %v863_v27 = vmul.f32 %v847_v3, %v847_v3  ;;  %vm943_vm0 = vcmp.eq.f32.partialorder %v1799_v5, inf }
 0x138   :  { %1177 = vrsqrt.f32 %v1801_v53  ;;  %v825_v16 = vpop.permute.xlu1 %824  ;;  %v902_v40 = vmax.f32 %v886_v39, 0.0  ;;  %v864_v14 = vmul.f32 %v848_v34, %v848_v34  ;;  %v873_v15 = vmul.f32 %v857_v43, %v857_v43  ;;  %v845_v7 = vpop.permute.xlu0 %844 }
 0x139   :  { %v874_v20 = vmul.f32 %v858_v31, %v858_v31  ;;  %v851_v23 = vmul.f32 %v825_v16, %v803_v8  ;;  %v852_v25 = vmul.f32 %v825_v16, %v804_v6  ;;  %v1817_v18 = vadd.f32 1e-12, %v901_v21 }
 0x13a   :  { %v1819_v51 = vadd.f32 1e-12, %v902_v40  ;;  %v879_v48 = vadd.f32 %v863_v27, %v1698_v62  ;;  %v880_v13 = vadd.f32 %v864_v14, %v1701_v63  ;;  %v889_v47 = vadd.f32 %v873_v15, %v1750_v61  ;;  %v1834_v62 = vld [vmem:[%s2024_s2 + $0x1b] ss:$0 sm:$0xff]  ;;  %s1265_s2 = smov [#allocation2]  }
 0x13b   :  { %v890_v24 = vadd.f32 %v874_v20, %v690_v35  ;;  %v867_v45 = vmul.f32 %v851_v23, %v851_v23  ;;  %v868_v29 = vmul.f32 %v852_v25, %v852_v25  ;;  %1179 = vrsqrt.f32 %v1817_v18  ;;  %s1109_s10 = sshll.u32 %s1265_s2, 4  ;;  %s1110_s10 = int_to_ptr.vmem [resolvable:$true] %s1109_s10 }
 0x13c   :  { %1181 = vrsqrt.f32 %v1819_v51  ;;  %v895_v63 = vmax.f32 %v879_v48, 0.0  ;;  %v896_v61 = vmax.f32 %v880_v13, 0.0  ;;  %v905_v36 = vmax.f32 %v889_v47, 0.0  ;;  %v1858_v32 = vpop.permute.xlu1 %832  ;;  %s1239_s11 = scalar_lea.vmem %s1110_s10, 2048  ;;  %p1244_p1 = scmp.lt.s32.totalorder %s1110_s10, %s1110_s10 }
 0x13d   :  { %v906_v56 = vmax.f32 %v890_v24, 0.0  ;;  %v811_v60 = vsub.f32 %v1777_v42, %v1834_v62  ;;  %v883_v4 = vadd.f32 %v867_v45, %v1713_v33  ;;  %v884_v9 = vadd.f32 %v868_v29, %v1716_v2  ;;  %p1240_p0 = scmp.ne.s32.totalorder %s1110_s10, %s1239_s11  ;;  %p1245_p2 = scmp.lt.s32.totalorder %s1239_s11, %s1239_s11 }
 0x13e   :  { %v1842_v52 = vadd.f32 1e-12, %v895_v63  ;;  %v1844_v1 = vadd.f32 1e-12, %v896_v61  ;;  %v1846_v54 = vadd.f32 1e-12, %v905_v36  ;;  %v861_v22 = vmul.f32 %v845_v7, %v813_v0 }
 0x13f   :  { %vm945_vm1 = vcmp.eq.f32.partialorder %v1799_v5, 0.0  ;;  %v946_v12 = vand.u32 2147483648, %v1799_v5  ;;  %vm950_vm2 = vcmp.eq.f32.partialorder %v1801_v53, inf  ;;  %v1851_v57 = vadd.f32 1e-12, %v906_v56  ;;  %p1246_p3 = por %p1245_p2, %p1244_p1 }
 0x140   :  { %vm952_vm3 = vcmp.eq.f32.partialorder %v1801_v53, 0.0  ;;  %v953_v33 = vand.u32 2147483648, %v1801_v53  ;;  %1183 = vrsqrt.f32 %v1842_v52  ;;  %v899_v2 = vmax.f32 %v883_v4, 0.0 }
 0x141   :  { %vm971_vm4 = vcmp.eq.f32.partialorder %v1817_v18, inf  ;;  %1185 = vrsqrt.f32 %v1844_v1  ;;  %v900_v46 = vmax.f32 %v884_v9, 0.0  ;;  %vm973_vm5 = vcmp.eq.f32.partialorder %v1817_v18, 0.0  ;;  %p1247_p4 = pnand %p1246_p3, %p1240_p0 }
 0x142   :  { %v974_v3 = vand.u32 2147483648, %v1817_v18  ;;  %1187 = vrsqrt.f32 %v1846_v54  ;;  %v862_v39 = vmul.f32 %v845_v7, %v814_v50  ;;  %vm978_vm6 = vcmp.eq.f32.partialorder %v1819_v51, inf }
 0x143   :  { %vm980_vm7 = vcmp.eq.f32.partialorder %v1819_v51, 0.0  ;;  %1189 = vrsqrt.f32 %v1851_v57  ;;  %v981_v31 = vand.u32 2147483648, %v1819_v51  ;;  %v1872_v35 = vadd.f32 1e-12, %v899_v2 }
 0x144   :  { %v1176_v55 = vpop.eup %1175  ;;  %v1875_v6 = vmul.f32 %v1858_v32, %v807_v37  ;;  %v1882_v21 = vadd.f32 1e-12, %v900_v46  ;;  %v877_v40 = vmul.f32 %v861_v22, %v861_v22  ;;  %v878_v15 = vmul.f32 %v862_v39, %v862_v39 }
 0x145   :  { %v1178_v10 = vpop.eup %1177  ;;  %v942_v49 = vmul.f32 %v1176_v55, %v1799_v5  ;;  %1191 = vrsqrt.f32 %v1872_v35  ;;  %vm929_vm8 = vcmp.eq.f32.partialorder %v1842_v52, inf  ;;  %vm931_vm9 = vcmp.eq.f32.partialorder %v1842_v52, 0.0 }
 0x146   :  { %v949_v34 = vmul.f32 %v1178_v10, %v1801_v53  ;;  %1193 = vrsqrt.f32 %v1882_v21  ;;  %vm936_vm10 = vcmp.eq.f32.partialorder %v1844_v1, inf  ;;  %vm938_vm11 = vcmp.eq.f32.partialorder %v1844_v1, 0.0 }
 0x147   :  { %v944_v43 = vsel %vm943_vm0, %v1799_v5, %v942_v49  ;;  %v932_v5 = vand.u32 2147483648, %v1842_v52  ;;  %vm999_vm12 = vcmp.eq.f32.partialorder %v1846_v54, inf  ;;  %v1002_v24 = vand.u32 2147483648, %v1846_v54 }
 0x148   :  { %v947_v8 = vsel %vm945_vm1, %v946_v12, %v944_v43  ;;  %v951_v16 = vsel %vm950_vm2, %v1801_v53, %v949_v34  ;;  %v1180_v20 = vpop.eup %1179  ;;  %v939_v53 = vand.u32 2147483648, %v1844_v1  ;;  %v893_v45 = vadd.f32 %v877_v40, %v1753_v26 }
 0x149   :  { %v954_v27 = vsel %vm952_vm3, %v953_v33, %v951_v16  ;;  %v1041_v14 = vsub.f32 0.0, %v947_v8  ;;  %v1182_v25 = vpop.eup %1181  ;;  %v970_v48 = vmul.f32 %v1180_v20, %v1817_v18  ;;  %vm1001_vm13 = vcmp.eq.f32.partialorder %v1846_v54, 0.0 }
 0x14a   :  { %v1042_v23 = vsub.f32 0.0, %v954_v27  ;;  %v977_v47 = vmul.f32 %v1182_v25, %v1819_v51  ;;  %vm1006_vm14 = vcmp.eq.f32.partialorder %v1851_v57, inf  ;;  %v894_v37 = vadd.f32 %v878_v15, %v1756_v30  ;;  %v841_v27 = vpop.permute.xlu1 %840 }
 0x14b   :  { %v1059_v28 = vmul.f32 1.442695, %v1041_v14  ;;  %v972_v29 = vsel %vm971_vm4, %v1817_v18, %v970_v48  ;;  %vm1008_vm15 = vcmp.eq.f32.partialorder %v1851_v57, 0.0  ;;  %v909_v26 = vmax.f32 %v893_v45, 0.0 }
 0x14c   :  { %v1061_v13 = vmul.f32 1.442695, %v1042_v23  ;;  %v975_v50 = vsel %vm973_vm5, %v974_v3, %v972_v29  ;;  %v979_v63 = vsel %vm978_vm6, %v1819_v51, %v977_v47  ;;  %v1009_v56 = vand.u32 2147483648, %v1851_v57 }
 0x14d   :  { %1195 = vpow2.f32 %v1059_v28  ;;  %v982_v61 = vsel %vm980_vm7, %v981_v31, %v979_v63  ;;  %v1045_v36 = vsub.f32 0.0, %v975_v50  ;;  %v910_v4 = vmax.f32 %v894_v37, 0.0  ;;  %v1184_v9 = vpop.eup %1183 }
 0x14e   :  { %1197 = vpow2.f32 %v1061_v13  ;;  %vm1087_vm0 = vcmask 130048   ;;  %v1046_v30 = vsub.f32 0.0, %v982_v61  ;;  %vm957_vm1 = vcmp.eq.f32.partialorder %v1872_v35, inf  ;;  %v1186_v7 = vpop.eup %1185 }
 0x14f   :  { %v960_v18 = vand.u32 2147483648, %v1872_v35  ;;  %v1916_v0 = vadd.f32 1e-12, %v909_v26  ;;  %v1067_v12 = vmul.f32 1.442695, %v1045_v36  ;;  %v928_v33 = vmul.f32 %v1184_v9, %v1842_v52  ;;  %v1188_v55 = vpop.eup %1187 }
 0x150   :  { %vm959_vm2 = vcmp.eq.f32.partialorder %v1872_v35, 0.0  ;;  %vm964_vm3 = vcmp.eq.f32.partialorder %v1882_v21, inf  ;;  %v967_v51 = vand.u32 2147483648, %v1882_v21  ;;  %v856_v2 = vmul.f32 %v1858_v32, %v808_v41  ;;  %v1190_v49 = vpop.eup %1189 }
 0x151   :  { %v1069_v46 = vmul.f32 1.442695, %v1046_v30  ;;  %v935_v22 = vmul.f32 %v1186_v7, %v1844_v1  ;;  %vm966_vm4 = vcmp.eq.f32.partialorder %v1882_v21, 0.0  ;;  %v1928_v10 = vadd.f32 1e-12, %v910_v4 }
 0x152   :  { %1199 = vrsqrt.f32 %v1916_v0  ;;  %v930_v3 = vsel %vm929_vm8, %v1842_v52, %v928_v33  ;;  %v998_v59 = vmul.f32 %v1188_v55, %v1846_v54  ;;  %v871_v44 = vmul.f32 %v1875_v6, %v1875_v6  ;;  %v1192_v6 = vpop.eup %1191 }
 0x153   :  { %1201 = vpow2.f32 %v1067_v12  ;;  %v933_v41 = vsel %vm931_vm9, %v932_v5, %v930_v3  ;;  %v937_v32 = vsel %vm936_vm10, %v1844_v1, %v935_v22  ;;  %v1005_v39 = vmul.f32 %v1190_v49, %v1851_v57  ;;  %v1194_v1 = vpop.eup %1193 }
 0x154   :  { %1203 = vpow2.f32 %v1069_v46  ;;  %v940_v34 = vsel %vm938_vm11, %v939_v53, %v937_v32  ;;  %v1039_v43 = vsub.f32 0.0, %v933_v41  ;;  %v1000_v31 = vsel %vm999_vm12, %v1846_v54, %v998_v59 }
 0x155   :  { %v872_v8 = vmul.f32 %v856_v2, %v856_v2  ;;  %v1040_v16 = vsub.f32 0.0, %v940_v34  ;;  %v1003_v52 = vsel %vm1001_vm13, %v1002_v24, %v1000_v31  ;;  %v1007_v40 = vsel %vm1006_vm14, %v1851_v57, %v1005_v39 }
 0x156   :  { %1205 = vrsqrt.f32 %v1928_v10  ;;  %v1055_v14 = vmul.f32 1.442695, %v1039_v43  ;;  %v1010_v15 = vsel %vm1008_vm15, %v1009_v56, %v1007_v40  ;;  %v1049_v20 = vsub.f32 0.0, %v1003_v52 }
 0x157   :  { %v956_v23 = vmul.f32 %v1192_v6, %v1872_v35  ;;  %v1057_v5 = vmul.f32 1.442695, %v1040_v16  ;;  %v1050_v25 = vsub.f32 0.0, %v1010_v15  ;;  %v963_v54 = vmul.f32 %v1194_v1, %v1882_v21 }
 0x158   :  { %v887_v28 = vadd.f32 %v871_v44, %v1728_v19  ;;  %1207 = vpow2.f32 %v1055_v14  ;;  %v1075_v48 = vmul.f32 1.442695, %v1049_v20  ;;  %v859_v57 = vmul.f32 %v841_v27, %v811_v60 }
 0x159   :  { %v958_v53 = vsel %vm957_vm1, %v1872_v35, %v956_v23  ;;  %1209 = vpow2.f32 %v1057_v5  ;;  %v1077_v47 = vmul.f32 1.442695, %v1050_v25  ;;  %v965_v19 = vsel %vm964_vm3, %v1882_v21, %v963_v54 }
 0x15a   :  { %v1196_v13 = vpop.eup %1195  ;;  %v961_v24 = vsel %vm959_vm2, %v960_v18, %v958_v53  ;;  %v812_v29 = vsub.f32 %v1768_v11, %v1834_v62  ;;  %1211 = vpow2.f32 %v1075_v48  ;;  %v968_v42 = vsel %vm966_vm4, %v967_v51, %v965_v19 }
 0x15b   :  { %v1198_v45 = vpop.eup %1197  ;;  %1090 = vst.msk [vmem:[#allocation2 + $0x10] sm:$0xff] %vm1087_vm0, %v1196_v13  ;;  %v1043_v60 = vsub.f32 0.0, %v961_v24  ;;  %1213 = vpow2.f32 %v1077_v47  ;;  %v1044_v35 = vsub.f32 0.0, %v968_v42  ;;  %v888_v37 = vadd.f32 %v872_v8, %v1731_v38 }
 0x15c   :  { %1091 = vst.msk [vmem:[#allocation2 + $0x18] sm:$0xff] %vm1087_vm0, %v1198_v45  ;;  %v903_v50 = vmax.f32 %v887_v28, 0.0  ;;  %v860_v26 = vmul.f32 %v841_v27, %v812_v29  ;;  %v875_v61 = vmul.f32 %v859_v57, %v859_v57  ;;  %vm1027_vm5 = vcmp.eq.f32.partialorder %v1916_v0, inf }
 0x15d   :  { %v1063_v63 = vmul.f32 1.442695, %v1043_v60  ;;  %v1065_v36 = vmul.f32 1.442695, %v1044_v35  ;;  %v904_v56 = vmax.f32 %v888_v37, 0.0  ;;  %v1030_v38 = vand.u32 2147483648, %v1916_v0 }
 0x15e   :  { %v1977_v11 = vadd.f32 1e-12, %v903_v50  ;;  %v876_v4 = vmul.f32 %v860_v26, %v860_v26  ;;  %v891_v21 = vadd.f32 %v875_v61, %v1743_v58  ;;  %vm1029_vm6 = vcmp.eq.f32.partialorder %v1916_v0, 0.0 }
 0x15f   :  { %v1200_v62 = vpop.eup %1199  ;;  %1215 = vpow2.f32 %v1063_v63  ;;  %v920_v18 = vadd.f32 1e-12, %v904_v56  ;;  %vm1034_vm7 = vcmp.eq.f32.partialorder %v1928_v10, inf  ;;  %v1037_v49 = vand.u32 2147483648, %v1928_v10 }
 0x160   :  { %v1202_v9 = vpop.eup %1201  ;;  %1217 = vpow2.f32 %v1065_v36  ;;  %v1026_v30 = vmul.f32 %v1200_v62, %v1916_v0  ;;  %v892_v12 = vadd.f32 %v876_v4, %v1746_v17  ;;  %v907_v2 = vmax.f32 %v891_v21, 0.0 }
 0x161   :  { %v1204_v7 = vpop.eup %1203  ;;  %1094 = vst.msk [vmem:[#allocation2 + $0x30] sm:$0xff] %vm1087_vm0, %v1202_v9  ;;  %1219 = vrsqrt.f32 %v1977_v11  ;;  %vm1036_vm8 = vcmp.eq.f32.partialorder %v1928_v10, 0.0  ;;  %vm985_vm9 = vcmp.eq.f32.partialorder %v1977_v11, inf  ;;  %v988_v40 = vand.u32 2147483648, %v1977_v11 }
 0x162   :  { %1095 = vst.msk [vmem:[#allocation2 + $0x38] sm:$0xff] %vm1087_vm0, %v1204_v7  ;;  %v1028_v58 = vsel %vm1027_vm5, %v1916_v0, %v1026_v30  ;;  %1221 = vrsqrt.f32 %v920_v18  ;;  %v908_v55 = vmax.f32 %v892_v12, 0.0  ;;  %v923_v3 = vadd.f32 1e-12, %v907_v2 }
 0x163   :  { %v1206_v33 = vpop.eup %1205  ;;  %v1031_v51 = vsel %vm1029_vm6, %v1030_v38, %v1028_v58  ;;  %vm987_vm10 = vcmp.eq.f32.partialorder %v1977_v11, 0.0  ;;  %vm992_vm11 = vcmp.eq.f32.partialorder %v920_v18, inf  ;;  %v995_v14 = vand.u32 2147483648, %v920_v18 }
 0x164   :  { %v1033_v46 = vmul.f32 %v1206_v33, %v1928_v10  ;;  %v1053_v22 = vsub.f32 0.0, %v1031_v51  ;;  %v1992_v17 = vadd.f32 1e-12, %v908_v55  ;;  %1223 = vrsqrt.f32 %v923_v3 }
 0x165   :  { %v1208_v59 = vpop.eup %1207  ;;  %vm994_vm12 = vcmp.eq.f32.partialorder %v920_v18, 0.0  ;;  %vm1013_vm13 = vcmp.eq.f32.partialorder %v923_v3, inf  ;;  %v1016_v47 = vand.u32 2147483648, %v923_v3  ;;  %vm1015_vm14 = vcmp.eq.f32.partialorder %v923_v3, 0.0 }
 0x166   :  { %v1035_v44 = vsel %vm1034_vm7, %v1928_v10, %v1033_v46  ;;  %v1083_v0 = vmul.f32 1.442695, %v1053_v22  ;;  %v1210_v41 = vpop.eup %1209  ;;  %1088 = vst.msk [vmem:[#allocation2] sm:$0xff] %vm1087_vm0, %v1208_v59  ;;  %vm1020_vm15 = vcmp.eq.f32.partialorder %v1992_v17, inf  ;;  %v1023_v29 = vand.u32 2147483648, %v1992_v17 }
 0x167   :  { %v1038_v32 = vsel %vm1036_vm8, %v1037_v49, %v1035_v44  ;;  %v1212_v39 = vpop.eup %1211  ;;  %1089 = vst.msk [vmem:[#allocation2 + $0x8] sm:$0xff] %vm1087_vm0, %v1210_v41  ;;  %vm1022_vm1 = vcmp.eq.f32.partialorder %v1992_v17, 0.0 }
 0x168   :  { %v1054_v34 = vsub.f32 0.0, %v1038_v32  ;;  %1225 = vpow2.f32 %v1083_v0  ;;  %v1214_v43 = vpop.eup %1213  ;;  %1098 = vst.msk [vmem:[#allocation2 + $0x50] sm:$0xff] %vm1087_vm0, %v1212_v39 }
 0x169   :  { %1227 = vrsqrt.f32 %v1992_v17  ;;  %1099 = vst.msk [vmem:[#allocation2 + $0x58] sm:$0xff] %vm1087_vm0, %v1214_v43 }
 0x16a   :  { %v1085_v31 = vmul.f32 1.442695, %v1054_v34 }
 0x16c   :  { %v1216_v10 = vpop.eup %1215  ;;  %1229 = vpow2.f32 %v1085_v31 }
 0x16d   :  { %v1218_v8 = vpop.eup %1217  ;;  %1092 = vst.msk [vmem:[#allocation2 + $0x20] sm:$0xff] %vm1087_vm0, %v1216_v10 }
 0x16e   :  { %v1220_v6 = vpop.eup %1219  ;;  %1093 = vst.msk [vmem:[#allocation2 + $0x28] sm:$0xff] %vm1087_vm0, %v1218_v8 }
 0x16f   :  { %v1222_v16 = vpop.eup %1221  ;;  %v984_v52 = vmul.f32 %v1220_v6, %v1977_v11 }
 0x170   :  { %v991_v27 = vmul.f32 %v1222_v16, %v920_v18 }
 0x171   :  { %v986_v1 = vsel %vm985_vm9, %v1977_v11, %v984_v52  ;;  %v1224_v25 = vpop.eup %1223 }
 0x172   :  { %v989_v15 = vsel %vm987_vm10, %v988_v40, %v986_v1  ;;  %v993_v20 = vsel %vm992_vm11, %v920_v18, %v991_v27  ;;  %v1012_v53 = vmul.f32 %v1224_v25, %v923_v3 }
 0x173   :  { %v996_v23 = vsel %vm994_vm12, %v995_v14, %v993_v20  ;;  %v1047_v5 = vsub.f32 0.0, %v989_v15 }
 0x174   :  { %v1048_v54 = vsub.f32 0.0, %v996_v23  ;;  %v1014_v24 = vsel %vm1013_vm13, %v923_v3, %v1012_v53 }
 0x175   :  { %v1226_v28 = vpop.eup %1225  ;;  %v1071_v48 = vmul.f32 1.442695, %v1047_v5  ;;  %v1017_v45 = vsel %vm1015_vm14, %v1016_v47, %v1014_v24 }
 0x176   :  { %v1228_v57 = vpop.eup %1227  ;;  %1102 = vst.msk [vmem:[#allocation2 + $0x70] sm:$0xff] %vm1087_vm0, %v1226_v28  ;;  %v1073_v13 = vmul.f32 1.442695, %v1048_v54  ;;  %v1051_v35 = vsub.f32 0.0, %v1017_v45 }
 0x177   :  { %1231 = vpow2.f32 %v1071_v48  ;;  %v1019_v19 = vmul.f32 %v1228_v57, %v1992_v17 }
 0x178   :  { %1233 = vpow2.f32 %v1073_v13  ;;  %v1079_v63 = vmul.f32 1.442695, %v1051_v35 }
 0x179   :  { %v1230_v42 = vpop.eup %1229  ;;  %v1021_v60 = vsel %vm1020_vm15, %v1992_v17, %v1019_v19 }
 0x17a   :  { %1103 = vst.msk [vmem:[#allocation2 + $0x78] sm:$0xff] %vm1087_vm0, %v1230_v42  ;;  %v1024_v37 = vsel %vm1022_vm1, %v1023_v29, %v1021_v60  ;;  %1235 = vpow2.f32 %v1079_v63 }
 0x17b   :  { %v1052_v50 = vsub.f32 0.0, %v1024_v37 }
 0x17d   :  { %v1081_v26 = vmul.f32 1.442695, %v1052_v50 }
 0x17f   :  { %1237 = vpow2.f32 %v1081_v26 }
 0x184   :  { %v1232_v61 = vpop.eup %1231 }
 0x185   :  { %v1234_v36 = vpop.eup %1233  ;;  %1096 = vst.msk [vmem:[#allocation2 + $0x40] sm:$0xff] %vm1087_vm0, %v1232_v61 }
 0x186   :  { %1097 = vst.msk [vmem:[#allocation2 + $0x48] sm:$0xff] %vm1087_vm0, %v1234_v36 }
 0x187   :  { %v1236_v56 = vpop.eup %1235 }
 0x188   :  { %1100 = vst.msk [vmem:[#allocation2 + $0x60] sm:$0xff] %vm1087_vm0, %v1236_v56 }
 0x18c   :  { %v1238_v11 = vpop.eup %1237 }
 0x18d   :  { %1101 = vst.msk [vmem:[#allocation2 + $0x68] sm:$0xff] %vm1087_vm0, %v1238_v11 }
 0x18e   :  { %1250 = shalt.err (!%p1247_p4)
}
 0x18f   :  { %s1266_s12 = smov 128   ;;  %s1267_s13 = smov 8  }
 0x190   :  { %1115 = dma.vmem_to_hbm [thread:$0]  %s1110_s10, 2048, %s2025_s3, [#allocation3], %s1266_s12, %s1266_s12, %s1267_s13  }
 0x191   :  { %1259 = dma.done.wait [#allocation3], 2048  }
 0x192   :  { %1260 = vsyncadd [#allocation3], 4294965248 }
 0x193   :  { %1119 = vsyncpa [#allocation3], 1 }

</bundles_post_ra>
